<compile_context>
chip_gen: v6e
topology: v6e:2x2x1
jax: 0.10.0
libtpu: 0.0.40
codegen_flags: <defaults>
</compile_context>

<pallas_src>
import jax
import jax.numpy as jnp
from jax.experimental import pallas as pl
from jax.experimental.pallas import tpu as pltpu


SHRINK_THRES = 0.0025
LEAKY_SLOPE = 0.01  # nn.LeakyReLU default
LANE = 128


def _round_up(n, m):
    return ((n + m - 1) // m) * m


def _leaky_relu(v):
    return jnp.where(v >= 0, v, LEAKY_SLOPE * v)


def memae_kernel(x_ref,
                 w1_ref, b1_ref, w2_ref, b2_ref, w3_ref, b3_ref,
                 mem_ref, memT_ref, memmask_ref,
                 w4_ref, b4_ref, w5_ref, b5_ref, w6_ref, b6_ref,
                 out_ref):
    # x may arrive as f32 (un-padded fast path) or bf16 (host-padded path).
    x = x_ref[...].astype(jnp.bfloat16)                             # (TB, Din_pad)

    # ---- encoder (bf16 matmuls, f32 accumulation) ----
    h = jnp.dot(x, w1_ref[...], preferred_element_type=jnp.float32) + b1_ref[...]
    h = _leaky_relu(h).astype(jnp.bfloat16)
    h = jnp.dot(h, w2_ref[...], preferred_element_type=jnp.float32) + b2_ref[...]
    h = _leaky_relu(h).astype(jnp.bfloat16)
    z = (jnp.dot(h, w3_ref[...], preferred_element_type=jnp.float32)
         + b3_ref[...]).astype(jnp.bfloat16)                        # (TB, 128)

    # ---- memory addressing ----
    # memT_ref is the pre-transposed bank (feat_pad, M_pad); memmask_ref is a
    # resident (1, M_pad) additive mask: 0 for valid slots, -1e30 for padding,
    # so padded slots get exactly zero softmax weight.
    att = jnp.dot(z, memT_ref[...], preferred_element_type=jnp.float32)
    att = att + memmask_ref[...]
    # softmax over dim=1 (exact normalization)
    att = att - jnp.max(att, axis=1, keepdims=True)
    e = jnp.exp(att)
    att_weight = e / jnp.sum(e, axis=1, keepdims=True)
    # softshrink(lambda): softmax output is non-negative -> negative branch dead.
    # (The reference module applies plain softshrink, no L1 re-normalization.)
    lam = jnp.float32(SHRINK_THRES)
    att_weight = jnp.where(att_weight > lam, att_weight - lam,
                           jnp.zeros_like(att_weight))
    mem_comb = jnp.dot(att_weight.astype(jnp.bfloat16), mem_ref[...],
                       preferred_element_type=jnp.float32).astype(jnp.bfloat16)

    # ---- decoder ----
    h = jnp.dot(mem_comb, w4_ref[...], preferred_element_type=jnp.float32) + b4_ref[...]
    h = _leaky_relu(h).astype(jnp.bfloat16)
    h = jnp.dot(h, w5_ref[...], preferred_element_type=jnp.float32) + b5_ref[...]
    h = _leaky_relu(h).astype(jnp.bfloat16)
    logits = jnp.dot(h, w6_ref[...], preferred_element_type=jnp.float32) + b6_ref[...]
    # exact sigmoid in f32, bf16 writeback
    out_ref[...] = (1.0 / (1.0 + jnp.exp(-logits))).astype(out_ref.dtype)


def prepare_params(params, input_dim, memory_size):
    """One-time host-side prep: zero-pad feature dims to multiples of 128,
    cast matmul operands to bf16, pre-transpose the memory bank and build the
    additive slot mask.  Zero-padding is semantics-preserving (padded weight
    rows/cols and biases are zero, LeakyReLU(0)=0, padded memory slots are
    masked to -1e30 before the softmax)."""
    d_in_p = _round_up(input_dim, LANE)
    m_p = _round_up(memory_size, LANE)
    dims = [(input_dim, 128), (128, 64), (64, 32),     # encoder
            (32, 64), (64, 128), (128, input_dim)]     # decoder
    pdims = [(d_in_p, 128), (128, 128), (128, 128),
             (128, 128), (128, 128), (128, d_in_p)]
    prepped = {}
    for idx in range(6):
        n = str(idx + 1)
        din, dout = dims[idx]
        dinp, doutp = pdims[idx]
        w = params["w" + n]
        b = params["b" + n]
        wp = jnp.zeros((dinp, doutp), jnp.float32).at[:din, :dout].set(w)
        bp = jnp.zeros((1, doutp), jnp.float32).at[:, :dout].set(b)
        prepped["w" + n] = wp.astype(jnp.bfloat16)
        prepped["b" + n] = bp                                   # f32 (post-accum add)
    mem = params["memory"]                                      # (M, 32)
    mem_p = jnp.zeros((m_p, LANE), jnp.float32).at[:memory_size, :32].set(mem)
    prepped["memory"] = mem_p.astype(jnp.bfloat16)              # (M_pad, 128)
    prepped["memory_T"] = mem_p.T.astype(jnp.bfloat16)          # (128, M_pad)
    slot = jnp.arange(m_p)
    prepped["memory_mask"] = jnp.where(slot < memory_size, 0.0,
                                       -1e30).astype(jnp.float32).reshape(1, m_p)
    return prepped


def memae_forward(x, prepped, input_dim, memory_size, block_batch=1024):
    """x: (B, input_dim) float32. prepped: output of prepare_params."""
    batch = x.shape[0]
    d_in_p = prepped["w1"].shape[0]
    d_out_p = prepped["w6"].shape[1]
    m_p = prepped["memory"].shape[0]

    # ---- generation-aware VMEM budget (64 MiB/TC on v7x, 128 MiB on v5e/v6e)
    try:
        vmem_cap = int(pltpu.get_tpu_info().vmem_capacity_bytes)
    except Exception:
        vmem_cap = 64 << 20  # conservative fallback

    def nbytes(a):
        return a.size * a.dtype.itemsize

    weight_bytes = sum(nbytes(v) for v in prepped.values())

    def step_bytes(t):
        # x tile (double-buffered, worst-case f32) + bf16 out tile (double-
        # buffered) + f32 intermediates + residents (Pallas still allocates
        # two buffers for constant-index inputs).
        return (2 * t * d_in_p * 4 + 2 * t * d_out_p * 2
                + t * (m_p + 8 * LANE) * 4 + 2 * weight_bytes)

    # ---- batch tile: as large as the VMEM budget allows (amortizes the
    # ~0.35 us per-grid-step overhead), shrunk for small batches.
    tb = min(block_batch, _round_up(batch, 8))
    while tb > 8 and step_bytes(tb) > vmem_cap - (8 << 20):
        tb = max(8, _round_up(tb // 2, 8))
    # Prefer >= 4 grid steps when the batch allows it (keeps both v7x
    # TensorCores busy under the "parallel" grid axis); never below 256 rows.
    while (_round_up(batch, tb) // tb) < 4 and tb > 256:
        tb = _round_up(tb // 2, 8)
    b_p = _round_up(batch, tb)
    grid = (b_p // tb,)

    # ---- input: skip the extra host pad/cast pass when shapes line up
    # (the f32 -> bf16 cast then happens inside the kernel).
    if b_p == batch and d_in_p == input_dim:
        xp = x
    else:
        xp = jnp.zeros((b_p, d_in_p), jnp.bfloat16)
        xp = xp.at[:batch, :input_dim].set(x.astype(jnp.bfloat16))

    def resident(arr):
        # Whole array, same block every grid step -> stays VMEM-resident.
        return pl.BlockSpec(arr.shape, lambda i: (0, 0))

    in_specs = [
        pl.BlockSpec((tb, d_in_p), lambda i: (i, 0)),            # streamed x tile
        resident(prepped["w1"]), resident(prepped["b1"]),
        resident(prepped["w2"]), resident(prepped["b2"]),
        resident(prepped["w3"]), resident(prepped["b3"]),
        resident(prepped["memory"]), resident(prepped["memory_T"]),
        resident(prepped["memory_mask"]),
        resident(prepped["w4"]), resident(prepped["b4"]),
        resident(prepped["w5"]), resident(prepped["b5"]),
        resident(prepped["w6"]), resident(prepped["b6"]),
    ]
    out_specs = pl.BlockSpec((tb, d_out_p), lambda i: (i, 0))

    vmem_limit = int(min(vmem_cap - (4 << 20), step_bytes(tb) + (16 << 20)))
    vmem_limit = max(vmem_limit, 32 << 20)

    out = pl.pallas_call(
        memae_kernel,
        out_shape=jax.ShapeDtypeStruct((b_p, d_out_p), jnp.bfloat16),
        grid=grid,
        in_specs=in_specs,
        out_specs=out_specs,
        compiler_params=pltpu.CompilerParams(
            dimension_semantics=("parallel",),
            vmem_limit_bytes=vmem_limit),
    )(xp,
      prepped["w1"], prepped["b1"],
      prepped["w2"], prepped["b2"],
      prepped["w3"], prepped["b3"],
      prepped["memory"], prepped["memory_T"], prepped["memory_mask"],
      prepped["w4"], prepped["b4"],
      prepped["w5"], prepped["b5"],
      prepped["w6"], prepped["b6"])

    # single fused slice + f32 cast
    return out[:batch, :input_dim].astype(jnp.float32)


def memae_reference(x, params):
    """Pure-JAX f32 reference of the PyTorch forward (eval-mode dropout)."""
    h = x
    for n in ("1", "2"):
        h = h @ params["w" + n] + params["b" + n]
        h = jnp.where(h >= 0, h, LEAKY_SLOPE * h)
    z = h @ params["w3"] + params["b3"]
    att = z @ params["memory"].T
    att = jax.nn.softmax(att, axis=1)
    att = jnp.where(att > SHRINK_THRES, att - SHRINK_THRES,
                    jnp.where(att < -SHRINK_THRES, att + SHRINK_THRES, 0.0))
    h = att @ params["memory"]
    for n in ("4", "5"):
        h = h @ params["w" + n] + params["b" + n]
        h = jnp.where(h >= 0, h, LEAKY_SLOPE * h)
    logits = h @ params["w6"] + params["b6"]
    return jax.nn.sigmoid(logits)


def init_params(key, input_dim, memory_size=50):
    """Deterministic synthetic parameter init (matching torch shapes),
    weights stored as (in, out)."""
    dims = [(input_dim, 128), (128, 64), (64, 32),   # encoder
            (32, 64), (64, 128), (128, input_dim)]   # decoder
    names = ["1", "2", "3", "4", "5", "6"]
    params = {}
    keys = jax.random.split(key, len(dims) + 1)
    for k, (din, dout), n in zip(keys[:-1], dims, names):
        kw, kb = jax.random.split(k)
        scale = 1.0 / jnp.sqrt(jnp.float32(din))
        params["w" + n] = jax.random.normal(kw, (din, dout), jnp.float32) * scale
        params["b" + n] = jax.random.normal(kb, (1, dout), jnp.float32) * scale
    params["memory"] = jax.random.normal(keys[-1], (memory_size, 32), jnp.float32)
    return params


if __name__ == "__main__":
    key = jax.random.PRNGKey(0)
    k_x, k_p = jax.random.split(key)

    batch = 8
    input_dim = 32
    memory_size = 50

    x = jax.random.uniform(k_x, (batch, input_dim), jnp.float32)
    params = init_params(k_p, input_dim, memory_size)
    prepped = prepare_params(params, input_dim, memory_size)

    out = memae_forward(x, prepped, input_dim, memory_size)
    out = jax.block_until_ready(out)

    assert out.shape == (batch, input_dim)
    assert out.dtype == jnp.float32
    assert bool(jnp.all(jnp.isfinite(out)))
    assert bool(jnp.all((out >= 0.0) & (out <= 1.0)))   # sigmoid output range

    ref = memae_reference(x, params)
    assert bool(jnp.max(jnp.abs(out - ref)) < 0.1)      # bf16-weight tolerance

    print("KERNEL_OK")
</pallas_src>

<mosaic_0001>
module attributes {stable_mosaic.version = 11 : i64} {
  func.func @memae_kernel(%arg0: i32, %arg1: memref<8x128xbf16, #tpu.memory_space<vmem>>, %arg2: memref<128x128xbf16, #tpu.memory_space<vmem>>, %arg3: memref<1x128xf32, #tpu.memory_space<vmem>>, %arg4: memref<128x128xbf16, #tpu.memory_space<vmem>>, %arg5: memref<1x128xf32, #tpu.memory_space<vmem>>, %arg6: memref<128x128xbf16, #tpu.memory_space<vmem>>, %arg7: memref<1x128xf32, #tpu.memory_space<vmem>>, %arg8: memref<128x128xbf16, #tpu.memory_space<vmem>>, %arg9: memref<128x128xbf16, #tpu.memory_space<vmem>>, %arg10: memref<1x128xf32, #tpu.memory_space<vmem>>, %arg11: memref<128x128xbf16, #tpu.memory_space<vmem>>, %arg12: memref<1x128xf32, #tpu.memory_space<vmem>>, %arg13: memref<128x128xbf16, #tpu.memory_space<vmem>>, %arg14: memref<1x128xf32, #tpu.memory_space<vmem>>, %arg15: memref<128x128xbf16, #tpu.memory_space<vmem>>, %arg16: memref<1x128xf32, #tpu.memory_space<vmem>>, %arg17: memref<8x128xbf16, #tpu.memory_space<vmem>>) attributes {dimension_semantics = [#tpu.dimension_semantics<parallel>], iteration_bounds = array<i64: 1>, scalar_prefetch = 0 : i64, scratch_operands = 0 : i64, tpu.core_type = #tpu.core_type<tc>, window_params = [{transform_indices = @transform_0, window_bounds = array<i64: 8, 128>}, {pipeline_mode = #tpu.pipeline_mode<synchronous>, transform_indices = @transform_1, window_bounds = array<i64: 128, 128>}, {pipeline_mode = #tpu.pipeline_mode<synchronous>, transform_indices = @transform_2, window_bounds = array<i64: 1, 128>}, {pipeline_mode = #tpu.pipeline_mode<synchronous>, transform_indices = @transform_3, window_bounds = array<i64: 128, 128>}, {pipeline_mode = #tpu.pipeline_mode<synchronous>, transform_indices = @transform_4, window_bounds = array<i64: 1, 128>}, {pipeline_mode = #tpu.pipeline_mode<synchronous>, transform_indices = @transform_5, window_bounds = array<i64: 128, 128>}, {pipeline_mode = #tpu.pipeline_mode<synchronous>, transform_indices = @transform_6, window_bounds = array<i64: 1, 128>}, {pipeline_mode = #tpu.pipeline_mode<synchronous>, transform_indices = @transform_7, window_bounds = array<i64: 128, 128>}, {pipeline_mode = #tpu.pipeline_mode<synchronous>, transform_indices = @transform_8, window_bounds = array<i64: 128, 128>}, {pipeline_mode = #tpu.pipeline_mode<synchronous>, transform_indices = @transform_9, window_bounds = array<i64: 1, 128>}, {pipeline_mode = #tpu.pipeline_mode<synchronous>, transform_indices = @transform_10, window_bounds = array<i64: 128, 128>}, {pipeline_mode = #tpu.pipeline_mode<synchronous>, transform_indices = @transform_11, window_bounds = array<i64: 1, 128>}, {pipeline_mode = #tpu.pipeline_mode<synchronous>, transform_indices = @transform_12, window_bounds = array<i64: 128, 128>}, {pipeline_mode = #tpu.pipeline_mode<synchronous>, transform_indices = @transform_13, window_bounds = array<i64: 1, 128>}, {pipeline_mode = #tpu.pipeline_mode<synchronous>, transform_indices = @transform_14, window_bounds = array<i64: 128, 128>}, {pipeline_mode = #tpu.pipeline_mode<synchronous>, transform_indices = @transform_15, window_bounds = array<i64: 1, 128>}, {transform_indices = @transform_16, window_bounds = array<i64: 8, 128>}]} {
    %c0 = arith.constant 0 : index
    %c0_0 = arith.constant 0 : index
    %0 = vector.load %arg1[%c0, %c0_0] : memref<8x128xbf16, #tpu.memory_space<vmem>>, vector<8x128xbf16>
    %c0_1 = arith.constant 0 : index
    %c0_2 = arith.constant 0 : index
    %1 = vector.load %arg2[%c0_1, %c0_2] : memref<128x128xbf16, #tpu.memory_space<vmem>>, vector<128x128xbf16>
    %cst = arith.constant dense<0.000000e+00> : vector<8x128xf32>
    %2 = tpu.matmul %0, %1, %cst {dimension_numbers = #tpu.dot_dimension_numbers<[1], [0], [0], [1], [0, 0, 1, 1], [], []>} : vector<8x128xbf16>, vector<128x128xbf16>, vector<8x128xf32> -> vector<8x128xf32>
    %c0_3 = arith.constant 0 : index
    %c0_4 = arith.constant 0 : index
    %3 = vector.load %arg3[%c0_3, %c0_4] : memref<1x128xf32, #tpu.memory_space<vmem>>, vector<1x128xf32>
    %4 = vector.broadcast %3 : vector<1x128xf32> to vector<8x128xf32>
    %5 = arith.addf %2, %4 : vector<8x128xf32>
    %cst_5 = arith.constant 0.000000e+00 : f32
    %6 = vector.broadcast %cst_5 : f32 to vector<8x128xf32>
    %7 = arith.cmpf oge, %5, %6 : vector<8x128xf32>
    %cst_6 = arith.constant 0.00999999977 : f32
    %8 = vector.broadcast %cst_6 : f32 to vector<8x128xf32>
    %9 = arith.mulf %8, %5 : vector<8x128xf32>
    %10 = arith.select %7, %5, %9 : vector<8x128xi1>, vector<8x128xf32>
    %11 = arith.truncf %10 : vector<8x128xf32> to vector<8x128xbf16>
    %c0_7 = arith.constant 0 : index
    %c0_8 = arith.constant 0 : index
    %12 = vector.load %arg4[%c0_7, %c0_8] : memref<128x128xbf16, #tpu.memory_space<vmem>>, vector<128x128xbf16>
    %cst_9 = arith.constant dense<0.000000e+00> : vector<8x128xf32>
    %13 = tpu.matmul %11, %12, %cst_9 {dimension_numbers = #tpu.dot_dimension_numbers<[1], [0], [0], [1], [0, 0, 1, 1], [], []>} : vector<8x128xbf16>, vector<128x128xbf16>, vector<8x128xf32> -> vector<8x128xf32>
    %c0_10 = arith.constant 0 : index
    %c0_11 = arith.constant 0 : index
    %14 = vector.load %arg5[%c0_10, %c0_11] : memref<1x128xf32, #tpu.memory_space<vmem>>, vector<1x128xf32>
    %15 = vector.broadcast %14 : vector<1x128xf32> to vector<8x128xf32>
    %16 = arith.addf %13, %15 : vector<8x128xf32>
    %cst_12 = arith.constant 0.000000e+00 : f32
    %17 = vector.broadcast %cst_12 : f32 to vector<8x128xf32>
    %18 = arith.cmpf oge, %16, %17 : vector<8x128xf32>
    %cst_13 = arith.constant 0.00999999977 : f32
    %19 = vector.broadcast %cst_13 : f32 to vector<8x128xf32>
    %20 = arith.mulf %19, %16 : vector<8x128xf32>
    %21 = arith.select %18, %16, %20 : vector<8x128xi1>, vector<8x128xf32>
    %22 = arith.truncf %21 : vector<8x128xf32> to vector<8x128xbf16>
    %c0_14 = arith.constant 0 : index
    %c0_15 = arith.constant 0 : index
    %23 = vector.load %arg6[%c0_14, %c0_15] : memref<128x128xbf16, #tpu.memory_space<vmem>>, vector<128x128xbf16>
    %cst_16 = arith.constant dense<0.000000e+00> : vector<8x128xf32>
    %24 = tpu.matmul %22, %23, %cst_16 {dimension_numbers = #tpu.dot_dimension_numbers<[1], [0], [0], [1], [0, 0, 1, 1], [], []>} : vector<8x128xbf16>, vector<128x128xbf16>, vector<8x128xf32> -> vector<8x128xf32>
    %c0_17 = arith.constant 0 : index
    %c0_18 = arith.constant 0 : index
    %25 = vector.load %arg7[%c0_17, %c0_18] : memref<1x128xf32, #tpu.memory_space<vmem>>, vector<1x128xf32>
    %26 = vector.broadcast %25 : vector<1x128xf32> to vector<8x128xf32>
    %27 = arith.addf %24, %26 : vector<8x128xf32>
    %28 = arith.truncf %27 : vector<8x128xf32> to vector<8x128xbf16>
    %c0_19 = arith.constant 0 : index
    %c0_20 = arith.constant 0 : index
    %29 = vector.load %arg9[%c0_19, %c0_20] : memref<128x128xbf16, #tpu.memory_space<vmem>>, vector<128x128xbf16>
    %cst_21 = arith.constant dense<0.000000e+00> : vector<8x128xf32>
    %30 = tpu.matmul %28, %29, %cst_21 {dimension_numbers = #tpu.dot_dimension_numbers<[1], [0], [0], [1], [0, 0, 1, 1], [], []>} : vector<8x128xbf16>, vector<128x128xbf16>, vector<8x128xf32> -> vector<8x128xf32>
    %c0_22 = arith.constant 0 : index
    %c0_23 = arith.constant 0 : index
    %31 = vector.load %arg10[%c0_22, %c0_23] : memref<1x128xf32, #tpu.memory_space<vmem>>, vector<1x128xf32>
    %32 = vector.broadcast %31 : vector<1x128xf32> to vector<8x128xf32>
    %33 = arith.addf %30, %32 : vector<8x128xf32>
    %cst_24 = arith.constant dense<0xFF800000> : vector<8xf32>
    %34 = vector.multi_reduction <maximumf>, %33, %cst_24 [1] : vector<8x128xf32> to vector<8xf32>
    %35 = vector.shape_cast %34 : vector<8xf32> to vector<8x1xf32>
    %36 = vector.broadcast %35 : vector<8x1xf32> to vector<8x128xf32>
    %37 = arith.subf %33, %36 : vector<8x128xf32>
    %38 = math.exp %37 : vector<8x128xf32>
    %cst_25 = arith.constant dense<0.000000e+00> : vector<8xf32>
    %39 = vector.multi_reduction <add>, %38, %cst_25 [1] : vector<8x128xf32> to vector<8xf32>
    %40 = vector.shape_cast %39 : vector<8xf32> to vector<8x1xf32>
    %41 = vector.broadcast %40 : vector<8x1xf32> to vector<8x128xf32>
    %42 = arith.divf %38, %41 : vector<8x128xf32>
    %cst_26 = arith.constant 2.500000e-03 : f32
    %43 = vector.broadcast %cst_26 : f32 to vector<8x128xf32>
    %44 = arith.cmpf ogt, %42, %43 : vector<8x128xf32>
    %cst_27 = arith.constant 2.500000e-03 : f32
    %45 = vector.broadcast %cst_27 : f32 to vector<8x128xf32>
    %46 = arith.subf %42, %45 : vector<8x128xf32>
    %cst_28 = arith.constant 0.000000e+00 : f32
    %47 = vector.broadcast %cst_28 : f32 to vector<8x128xf32>
    %48 = arith.select %44, %46, %47 : vector<8x128xi1>, vector<8x128xf32>
    %49 = arith.truncf %48 : vector<8x128xf32> to vector<8x128xbf16>
    %c0_29 = arith.constant 0 : index
    %c0_30 = arith.constant 0 : index
    %50 = vector.load %arg8[%c0_29, %c0_30] : memref<128x128xbf16, #tpu.memory_space<vmem>>, vector<128x128xbf16>
    %cst_31 = arith.constant dense<0.000000e+00> : vector<8x128xf32>
    %51 = tpu.matmul %49, %50, %cst_31 {dimension_numbers = #tpu.dot_dimension_numbers<[1], [0], [0], [1], [0, 0, 1, 1], [], []>} : vector<8x128xbf16>, vector<128x128xbf16>, vector<8x128xf32> -> vector<8x128xf32>
    %52 = arith.truncf %51 : vector<8x128xf32> to vector<8x128xbf16>
    %c0_32 = arith.constant 0 : index
    %c0_33 = arith.constant 0 : index
    %53 = vector.load %arg11[%c0_32, %c0_33] : memref<128x128xbf16, #tpu.memory_space<vmem>>, vector<128x128xbf16>
    %cst_34 = arith.constant dense<0.000000e+00> : vector<8x128xf32>
    %54 = tpu.matmul %52, %53, %cst_34 {dimension_numbers = #tpu.dot_dimension_numbers<[1], [0], [0], [1], [0, 0, 1, 1], [], []>} : vector<8x128xbf16>, vector<128x128xbf16>, vector<8x128xf32> -> vector<8x128xf32>
    %c0_35 = arith.constant 0 : index
    %c0_36 = arith.constant 0 : index
    %55 = vector.load %arg12[%c0_35, %c0_36] : memref<1x128xf32, #tpu.memory_space<vmem>>, vector<1x128xf32>
    %56 = vector.broadcast %55 : vector<1x128xf32> to vector<8x128xf32>
    %57 = arith.addf %54, %56 : vector<8x128xf32>
    %cst_37 = arith.constant 0.000000e+00 : f32
    %58 = vector.broadcast %cst_37 : f32 to vector<8x128xf32>
    %59 = arith.cmpf oge, %57, %58 : vector<8x128xf32>
    %cst_38 = arith.constant 0.00999999977 : f32
    %60 = vector.broadcast %cst_38 : f32 to vector<8x128xf32>
    %61 = arith.mulf %60, %57 : vector<8x128xf32>
    %62 = arith.select %59, %57, %61 : vector<8x128xi1>, vector<8x128xf32>
    %63 = arith.truncf %62 : vector<8x128xf32> to vector<8x128xbf16>
    %c0_39 = arith.constant 0 : index
    %c0_40 = arith.constant 0 : index
    %64 = vector.load %arg13[%c0_39, %c0_40] : memref<128x128xbf16, #tpu.memory_space<vmem>>, vector<128x128xbf16>
    %cst_41 = arith.constant dense<0.000000e+00> : vector<8x128xf32>
    %65 = tpu.matmul %63, %64, %cst_41 {dimension_numbers = #tpu.dot_dimension_numbers<[1], [0], [0], [1], [0, 0, 1, 1], [], []>} : vector<8x128xbf16>, vector<128x128xbf16>, vector<8x128xf32> -> vector<8x128xf32>
    %c0_42 = arith.constant 0 : index
    %c0_43 = arith.constant 0 : index
    %66 = vector.load %arg14[%c0_42, %c0_43] : memref<1x128xf32, #tpu.memory_space<vmem>>, vector<1x128xf32>
    %67 = vector.broadcast %66 : vector<1x128xf32> to vector<8x128xf32>
    %68 = arith.addf %65, %67 : vector<8x128xf32>
    %cst_44 = arith.constant 0.000000e+00 : f32
    %69 = vector.broadcast %cst_44 : f32 to vector<8x128xf32>
    %70 = arith.cmpf oge, %68, %69 : vector<8x128xf32>
    %cst_45 = arith.constant 0.00999999977 : f32
    %71 = vector.broadcast %cst_45 : f32 to vector<8x128xf32>
    %72 = arith.mulf %71, %68 : vector<8x128xf32>
    %73 = arith.select %70, %68, %72 : vector<8x128xi1>, vector<8x128xf32>
    %74 = arith.truncf %73 : vector<8x128xf32> to vector<8x128xbf16>
    %c0_46 = arith.constant 0 : index
    %c0_47 = arith.constant 0 : index
    %75 = vector.load %arg15[%c0_46, %c0_47] : memref<128x128xbf16, #tpu.memory_space<vmem>>, vector<128x128xbf16>
    %cst_48 = arith.constant dense<0.000000e+00> : vector<8x128xf32>
    %76 = tpu.matmul %74, %75, %cst_48 {dimension_numbers = #tpu.dot_dimension_numbers<[1], [0], [0], [1], [0, 0, 1, 1], [], []>} : vector<8x128xbf16>, vector<128x128xbf16>, vector<8x128xf32> -> vector<8x128xf32>
    %c0_49 = arith.constant 0 : index
    %c0_50 = arith.constant 0 : index
    %77 = vector.load %arg16[%c0_49, %c0_50] : memref<1x128xf32, #tpu.memory_space<vmem>>, vector<1x128xf32>
    %78 = vector.broadcast %77 : vector<1x128xf32> to vector<8x128xf32>
    %79 = arith.addf %76, %78 : vector<8x128xf32>
    %cst_51 = arith.constant 0.000000e+00 : f32
    %80 = vector.broadcast %cst_51 : f32 to vector<8x128xf32>
    %81 = arith.subf %80, %79 : vector<8x128xf32>
    %82 = math.exp %81 : vector<8x128xf32>
    %cst_52 = arith.constant 1.000000e+00 : f32
    %83 = vector.broadcast %cst_52 : f32 to vector<8x128xf32>
    %84 = arith.addf %83, %82 : vector<8x128xf32>
    %cst_53 = arith.constant 1.000000e+00 : f32
    %85 = vector.broadcast %cst_53 : f32 to vector<8x128xf32>
    %86 = arith.divf %85, %84 : vector<8x128xf32>
    %87 = arith.truncf %86 : vector<8x128xf32> to vector<8x128xbf16>
    %c0_54 = arith.constant 0 : index
    %c0_55 = arith.constant 0 : index
    %88 = vector.load %arg17[%c0_54, %c0_55] : memref<8x128xbf16, #tpu.memory_space<vmem>>, vector<8x128xbf16>
    tpu.vector_store %arg17[%c0_54, %c0_55], %87 {strides = array<i32>} : memref<8x128xbf16, #tpu.memory_space<vmem>>, vector<8x128xbf16>,
    return
  }
  func.func @transform_0(%arg0: i32) -> (i32, i32) {
    %c0_i32 = arith.constant 0 : i32
    %c0_i32_0 = arith.constant 0 : i32
    return %arg0, %c0_i32 : i32, i32
  }
  func.func @transform_1(%arg0: i32) -> (i32, i32) {
    %c0_i32 = arith.constant 0 : i32
    %c0_i32_0 = arith.constant 0 : i32
    %c0_i32_1 = arith.constant 0 : i32
    return %c0_i32, %c0_i32_0 : i32, i32
  }
  func.func @transform_2(%arg0: i32) -> (i32, i32) {
    %c0_i32 = arith.constant 0 : i32
    %c0_i32_0 = arith.constant 0 : i32
    %c0_i32_1 = arith.constant 0 : i32
    return %c0_i32, %c0_i32_0 : i32, i32
  }
  func.func @transform_3(%arg0: i32) -> (i32, i32) {
    %c0_i32 = arith.constant 0 : i32
    %c0_i32_0 = arith.constant 0 : i32
    %c0_i32_1 = arith.constant 0 : i32
    return %c0_i32, %c0_i32_0 : i32, i32
  }
  func.func @transform_4(%arg0: i32) -> (i32, i32) {
    %c0_i32 = arith.constant 0 : i32
    %c0_i32_0 = arith.constant 0 : i32
    %c0_i32_1 = arith.constant 0 : i32
    return %c0_i32, %c0_i32_0 : i32, i32
  }
  func.func @transform_5(%arg0: i32) -> (i32, i32) {
    %c0_i32 = arith.constant 0 : i32
    %c0_i32_0 = arith.constant 0 : i32
    %c0_i32_1 = arith.constant 0 : i32
    return %c0_i32, %c0_i32_0 : i32, i32
  }
  func.func @transform_6(%arg0: i32) -> (i32, i32) {
    %c0_i32 = arith.constant 0 : i32
    %c0_i32_0 = arith.constant 0 : i32
    %c0_i32_1 = arith.constant 0 : i32
    return %c0_i32, %c0_i32_0 : i32, i32
  }
  func.func @transform_7(%arg0: i32) -> (i32, i32) {
    %c0_i32 = arith.constant 0 : i32
    %c0_i32_0 = arith.constant 0 : i32
    %c0_i32_1 = arith.constant 0 : i32
    return %c0_i32, %c0_i32_0 : i32, i32
  }
  func.func @transform_8(%arg0: i32) -> (i32, i32) {
    %c0_i32 = arith.constant 0 : i32
    %c0_i32_0 = arith.constant 0 : i32
    %c0_i32_1 = arith.constant 0 : i32
    return %c0_i32, %c0_i32_0 : i32, i32
  }
  func.func @transform_9(%arg0: i32) -> (i32, i32) {
    %c0_i32 = arith.constant 0 : i32
    %c0_i32_0 = arith.constant 0 : i32
    %c0_i32_1 = arith.constant 0 : i32
    return %c0_i32, %c0_i32_0 : i32, i32
  }
  func.func @transform_10(%arg0: i32) -> (i32, i32) {
    %c0_i32 = arith.constant 0 : i32
    %c0_i32_0 = arith.constant 0 : i32
    %c0_i32_1 = arith.constant 0 : i32
    return %c0_i32, %c0_i32_0 : i32, i32
  }
  func.func @transform_11(%arg0: i32) -> (i32, i32) {
    %c0_i32 = arith.constant 0 : i32
    %c0_i32_0 = arith.constant 0 : i32
    %c0_i32_1 = arith.constant 0 : i32
    return %c0_i32, %c0_i32_0 : i32, i32
  }
  func.func @transform_12(%arg0: i32) -> (i32, i32) {
    %c0_i32 = arith.constant 0 : i32
    %c0_i32_0 = arith.constant 0 : i32
    %c0_i32_1 = arith.constant 0 : i32
    return %c0_i32, %c0_i32_0 : i32, i32
  }
  func.func @transform_13(%arg0: i32) -> (i32, i32) {
    %c0_i32 = arith.constant 0 : i32
    %c0_i32_0 = arith.constant 0 : i32
    %c0_i32_1 = arith.constant 0 : i32
    return %c0_i32, %c0_i32_0 : i32, i32
  }
  func.func @transform_14(%arg0: i32) -> (i32, i32) {
    %c0_i32 = arith.constant 0 : i32
    %c0_i32_0 = arith.constant 0 : i32
    %c0_i32_1 = arith.constant 0 : i32
    return %c0_i32, %c0_i32_0 : i32, i32
  }
  func.func @transform_15(%arg0: i32) -> (i32, i32) {
    %c0_i32 = arith.constant 0 : i32
    %c0_i32_0 = arith.constant 0 : i32
    %c0_i32_1 = arith.constant 0 : i32
    return %c0_i32, %c0_i32_0 : i32, i32
  }
  func.func @transform_16(%arg0: i32) -> (i32, i32) {
    %c0_i32 = arith.constant 0 : i32
    %c0_i32_0 = arith.constant 0 : i32
    return %arg0, %c0_i32 : i32, i32
  }
}

</mosaic_0001>

<bundles_post_ra>
// kernel: tpu_custom_call.1
= control target key start
LH: loop header
LB: loop body
LE: loop exit
PB: predicated region body
PF: predicated region fallthrough
CT: control target
= control target key end

     0   :  { %s1974_s0 = inlined_call_operand.hbm [shape: bf16[8,128], index: 0, kind: input, shape index: {}]   ;;  %s1975_s1 = inlined_call_operand.hbm [shape: bf16[128,128], index: 1, kind: input, shape index: {}]   ;;  %s1976_s2 = inlined_call_operand.vmem [shape: f32[1,128], index: 2, kind: input, shape index: {}]   ;;  %s1977_s3 = inlined_call_operand.hbm [shape: bf16[128,128], index: 3, kind: input, shape index: {}]   ;;  %s1978_s4 = inlined_call_operand.vmem [shape: f32[1,128], index: 4, kind: input, shape index: {}]   ;;  %s1979_s5 = inlined_call_operand.hbm [shape: bf16[128,128], index: 5, kind: input, shape index: {}]   ;;  %s1980_s6 = inlined_call_operand.vmem [shape: f32[1,128], index: 6, kind: input, shape index: {}]   ;;  %s1981_s7 = inlined_call_operand.hbm [shape: bf16[128,128], index: 7, kind: input, shape index: {}]   ;;  %s1982_s8 = inlined_call_operand.hbm [shape: bf16[128,128], index: 8, kind: input, shape index: {}]   ;;  %s1983_s9 = inlined_call_operand.vmem [shape: f32[1,128], index: 9, kind: input, shape index: {}]   ;;  %s1984_s10 = inlined_call_operand.hbm [shape: bf16[128,128], index: 10, kind: input, shape index: {}]   ;;  %s1985_s11 = inlined_call_operand.vmem [shape: f32[1,128], index: 11, kind: input, shape index: {}]   ;;  %s1986_s12 = inlined_call_operand.hbm [shape: bf16[128,128], index: 12, kind: input, shape index: {}]   ;;  %s1987_s13 = inlined_call_operand.vmem [shape: f32[1,128], index: 13, kind: input, shape index: {}]   ;;  %s1988_s14 = inlined_call_operand.hbm [shape: bf16[128,128], index: 14, kind: input, shape index: {}]   ;;  %s1989_s15 = inlined_call_operand.vmem [shape: f32[1,128], index: 15, kind: input, shape index: {}]   ;;  %s1990_s16 = inlined_call_operand.hbm [shape: bf16[8,128], index: 16, kind: output, shape index: {}]  }
   0x1   :  { %1991 = sst [smem:[#allocation24_spill]] %s1974_s0 }
   0x2   :  { %21 = vsyncpa [#allocation3], 0 }
   0x3   :  { %22 = vsyncpa [#allocation6], 0 }
   0x4   :  { %23 = vsyncpa [#allocation9], 0 }
   0x5   :  { %24 = vsyncpa [#allocation12], 0 }
   0x6   :  { %25 = vsyncpa [#allocation15], 0 }
   0x7   :  { %26 = vsyncpa [#allocation4], 0  ;;  %s1720_s21 = smov [#allocation5]  }
   0x8   :  { %s42_s22 = sshll.u32 %s1720_s21, 4  ;;  %s43_s22 = int_to_ptr.vmem [resolvable:$true] %s42_s22 }
   0x9   :  { %s1516_s23 = scalar_lea.vmem %s43_s22, 1024  ;;  %p1521_p1 = scmp.lt.s32.totalorder %s43_s22, %s43_s22 }
   0xa   :  { %p1517_p0 = scmp.ne.s32.totalorder %s43_s22, %s1516_s23  ;;  %p1522_p2 = scmp.lt.s32.totalorder %s1516_s23, %s1516_s23 }
   0xc   :  { %p1523_p3 = por %p1522_p2, %p1521_p1 }
   0xe   :  { %p1524_p4 = pnand %p1523_p3, %p1517_p0 }
  0x10   :  { %1527 = shalt.err (!%p1524_p4)
}
  0x11   :  { %s1721_s24 = smov 64   ;;  %s1722_s25 = smov 4  }
  0x12   :  { %48 = dma.hbm_to_vmem [thread:$0]  %s1975_s1, 1024, %s43_s22, [#allocation6], %s1721_s24, %s1721_s24, %s1722_s25  }
  0x13   :  { %s1723_s28 = smov [#allocation8]   ;;  %s1724_s30 = smov [#allocation11]  }
  0x14   :  { %s70_s29 = sshll.u32 %s1723_s28, 4  ;;  %s96_s0 = sshll.u32 %s1724_s30, 4  ;;  %s71_s29 = int_to_ptr.vmem [resolvable:$true] %s70_s29  ;;  %s97_s0 = int_to_ptr.vmem [resolvable:$true] %s96_s0 }
  0x15   :  { %s1536_s17 = scalar_lea.vmem %s71_s29, 1024  ;;  %p1541_p6 = scmp.lt.s32.totalorder %s71_s29, %s71_s29 }
  0x16   :  { %p1537_p5 = scmp.ne.s32.totalorder %s71_s29, %s1536_s17  ;;  %p1542_p7 = scmp.lt.s32.totalorder %s1536_s17, %s1536_s17 }
  0x18   :  { %p1543_p8 = por %p1542_p7, %p1541_p6 }
  0x1a   :  { %p1544_p9 = pnand %p1543_p8, %p1537_p5 }
  0x1c   :  { %1547 = shalt.err (!%p1544_p9)
}
  0x1d   :  { %76 = dma.hbm_to_vmem [thread:$0]  %s1979_s5, 1024, %s71_s29, [#allocation9], %s1721_s24, %s1721_s24, %s1722_s25  }
  0x1e   :  { %s1556_s1 = scalar_lea.vmem %s97_s0, 1024  ;;  %p1561_p11 = scmp.lt.s32.totalorder %s97_s0, %s97_s0 }
  0x1f   :  { %p1557_p10 = scmp.ne.s32.totalorder %s97_s0, %s1556_s1  ;;  %p1562_p12 = scmp.lt.s32.totalorder %s1556_s1, %s1556_s1 }
  0x21   :  { %p1563_p13 = por %p1562_p12, %p1561_p11 }
  0x23   :  { %p1564_p0 = pnand %p1563_p13, %p1557_p10 }
  0x25   :  { %1567 = shalt.err (!%p1564_p0)
}
  0x26   :  { %102 = dma.hbm_to_vmem [thread:$0]  %s1982_s8, 1024, %s97_s0, [#allocation12], %s1721_s24, %s1721_s24, %s1722_s25  }
  0x27   :  { %s1725_s22 = smov [#allocation14]   ;;  %s1726_s26 = smov [#allocation2]  }
  0x28   :  { %s124_s23 = sshll.u32 %s1725_s22, 4  ;;  %s33_s5 = sshll.u32 %s1726_s26, 4  ;;  %s125_s23 = int_to_ptr.vmem [resolvable:$true] %s124_s23  ;;  %s34_s5 = int_to_ptr.vmem [resolvable:$true] %s33_s5 }
  0x29   :  { %s1576_s27 = scalar_lea.vmem %s125_s23, 1024  ;;  %p1581_p2 = scmp.lt.s32.totalorder %s125_s23, %s125_s23 }
  0x2a   :  { %p1577_p1 = scmp.ne.s32.totalorder %s125_s23, %s1576_s27  ;;  %p1582_p3 = scmp.lt.s32.totalorder %s1576_s27, %s1576_s27 }
  0x2c   :  { %p1583_p4 = por %p1582_p3, %p1581_p2 }
  0x2e   :  { %p1584_p5 = pnand %p1583_p4, %p1577_p1 }
  0x30   :  { %1587 = shalt.err (!%p1584_p5)
}
  0x31   :  { %130 = dma.hbm_to_vmem [thread:$0]  %s1986_s12, 1024, %s125_s23, [#allocation15], %s1721_s24, %s1721_s24, %s1722_s25  }
  0x32   :  { %s1596_s8 = scalar_lea.vmem %s34_s5, 64  ;;  %p1601_p7 = scmp.lt.s32.totalorder %s34_s5, %s34_s5 }
  0x33   :  { %p1597_p6 = scmp.ne.s32.totalorder %s34_s5, %s1596_s8  ;;  %p1602_p8 = scmp.lt.s32.totalorder %s1596_s8, %s1596_s8 }
  0x35   :  { %p1603_p9 = por %p1602_p8, %p1601_p7 }
  0x37   :  { %p1604_p10 = pnand %p1603_p9, %p1597_p6 }
  0x39   :  { %1607 = shalt.err (!%p1604_p10)
}
  0x3a   :  { %s1992_s17 = sld [smem:[#allocation24_spill]]  ;;  %s1727_s18 = smov [#allocation7]  }
  0x3b   :  { %s56_s19 = sshll.u32 %s1727_s18, 4  ;;  %s1728_s1 = smov [#allocation10]   ;;  %s57_s19 = int_to_ptr.vmem [resolvable:$true] %s56_s19 }
  0x3c   :  { %s84_s20 = sshll.u32 %s1728_s1, 4  ;;  %s1616_s21 = scalar_lea.vmem %s57_s19, 1024  ;;  %s85_s20 = int_to_ptr.vmem [resolvable:$true] %s84_s20 }
  0x3d   :  { %p1617_p11 = scmp.ne.s32.totalorder %s57_s19, %s1616_s21  ;;  %p1621_p12 = scmp.lt.s32.totalorder %s57_s19, %s57_s19 }
  0x3e   :  { %p1622_p13 = scmp.lt.s32.totalorder %s1616_s21, %s1616_s21 }
  0x40   :  { %36 = dma.hbm_to_vmem [thread:$0]  %s1992_s17, 64, %s34_s5, [#allocation3]  }
  0x41   :  { %p1623_p0 = por %p1622_p13, %p1621_p12 }
  0x43   :  { %p1624_p1 = pnand %p1623_p0, %p1617_p11 }
  0x45   :  { %1627 = shalt.err (!%p1624_p1)
}
  0x46   :  { %62 = dma.hbm_to_vmem [thread:$0]  %s1977_s3, 1024, %s57_s19, [#allocation6], %s1721_s24, %s1721_s24, %s1722_s25  }
  0x47   :  { %s1636_s23 = scalar_lea.vmem %s85_s20, 1024  ;;  %p1641_p3 = scmp.lt.s32.totalorder %s85_s20, %s85_s20 }
  0x48   :  { %p1637_p2 = scmp.ne.s32.totalorder %s85_s20, %s1636_s23  ;;  %p1642_p4 = scmp.lt.s32.totalorder %s1636_s23, %s1636_s23 }
  0x4a   :  { %p1643_p5 = por %p1642_p4, %p1641_p3 }
  0x4c   :  { %p1644_p6 = pnand %p1643_p5, %p1637_p2 }
  0x4e   :  { %1647 = shalt.err (!%p1644_p6)
}
  0x4f   :  { %90 = dma.hbm_to_vmem [thread:$0]  %s1981_s7, 1024, %s85_s20, [#allocation9], %s1721_s24, %s1721_s24, %s1722_s25  }
  0x50   :  { %s1729_s27 = smov [#allocation13]   ;;  %s1730_s29 = smov [#allocation16]  }
  0x51   :  { %s110_s28 = sshll.u32 %s1729_s27, 4  ;;  %s138_s3 = sshll.u32 %s1730_s29, 4  ;;  %s111_s28 = int_to_ptr.vmem [resolvable:$true] %s110_s28  ;;  %s139_s3 = int_to_ptr.vmem [resolvable:$true] %s138_s3 }
  0x52   :  { %s1656_s8 = scalar_lea.vmem %s111_s28, 1024  ;;  %p1661_p8 = scmp.lt.s32.totalorder %s111_s28, %s111_s28 }
  0x53   :  { %p1657_p7 = scmp.ne.s32.totalorder %s111_s28, %s1656_s8  ;;  %p1662_p9 = scmp.lt.s32.totalorder %s1656_s8, %s1656_s8 }
  0x55   :  { %p1663_p10 = por %p1662_p9, %p1661_p8 }
  0x57   :  { %p1664_p11 = pnand %p1663_p10, %p1657_p7 }
  0x59   :  { %1667 = shalt.err (!%p1664_p11)
}
  0x5a   :  { %116 = dma.hbm_to_vmem [thread:$0]  %s1984_s10, 1024, %s111_s28, [#allocation12], %s1721_s24, %s1721_s24, %s1722_s25  }
  0x5b   :  { %s1676_s7 = scalar_lea.vmem %s139_s3, 1024  ;;  %p1681_p13 = scmp.lt.s32.totalorder %s139_s3, %s139_s3 }
  0x5c   :  { %p1677_p12 = scmp.ne.s32.totalorder %s139_s3, %s1676_s7  ;;  %p1682_p0 = scmp.lt.s32.totalorder %s1676_s7, %s1676_s7 }
  0x5e   :  { %p1683_p1 = por %p1682_p0, %p1681_p13 }
  0x60   :  { %p1684_p2 = pnand %p1683_p1, %p1677_p12 }
  0x62   :  { %1687 = shalt.err (!%p1684_p2)
}
  0x63   :  { %144 = dma.hbm_to_vmem [thread:$0]  %s1988_s14, 1024, %s139_s3, [#allocation15], %s1721_s24, %s1721_s24, %s1722_s25  }
  0x64   :  { %1708 = dma.done.wait [#allocation3], 64  }
  0x65   :  { %1709 = vsyncadd [#allocation3], 4294967232 }
  0x66   :  { %1710 = dma.done.wait [#allocation6], 2048  }
  0x67   :  { %1711 = vsyncadd [#allocation6], 4294965248 }
  0x68   :  { %1712 = dma.done.wait [#allocation9], 2048  }
  0x69   :  { %1713 = vsyncadd [#allocation9], 4294965248 }
  0x6a   :  { %1714 = dma.done.wait [#allocation12], 2048  }
  0x6b   :  { %1715 = vsyncadd [#allocation12], 4294965248 }
  0x6c   :  { %1716 = dma.done.wait [#allocation15], 2048  }
  0x6d   :  { %1717 = vsyncadd [#allocation15], 4294965248  ;;  %v1731_v0 = vmov 0.0   ;;  %vm1732_vm0 = vmmov 0   ;;  %v1436_v1 = vld [vmem:[#allocation5 + $0x38] sm:$0xff]   ;;  %v1437_v2 = vld [vmem:[#allocation5 + $0x30] sm:$0xff]  }
  0x6e   :  { %1262 = vmatprep.subr.bf16.mxu0 %v1731_v0  ;;  %1278 = vmatprep.mubr.msk.bf16.mxu0 %vm1732_vm0, %v1731_v0  ;;  %v1438_v3 = vld [vmem:[#allocation5 + $0x28] sm:$0xff]   ;;  %v1444_v4 = vld [vmem:[#allocation7 + $0x38] sm:$0xff]   ;;  %v1439_v5 = vld [vmem:[#allocation5 + $0x20] sm:$0xff]  }
  0x6f   :  { %1282 = vmatprep.subr.bf16.mxu1 %v1731_v0  ;;  %1298 = vmatprep.mubr.msk.bf16.mxu1 %vm1732_vm0, %v1731_v0  ;;  %v1445_v6 = vld [vmem:[#allocation7 + $0x30] sm:$0xff]   ;;  %v1440_v7 = vld [vmem:[#allocation5 + $0x18] sm:$0xff]   ;;  %v1446_v8 = vld [vmem:[#allocation7 + $0x28] sm:$0xff]  }
  0x70   :  { %1263 = vmatpush3.bf16.msra.mxu0 %v1436_v1  ;;  %1283 = vmatpush3.bf16.msra.mxu1 %v1444_v4  ;;  %v1441_v9 = vld [vmem:[#allocation5 + $0x10] sm:$0xff]   ;;  %v1447_v10 = vld [vmem:[#allocation7 + $0x20] sm:$0xff]   ;;  %v1442_v11 = vld [vmem:[#allocation5 + $0x8] sm:$0xff]  }
  0x71   :  { %1264 = vmatprep.subr.bf16.mxu0 %v1731_v0  ;;  %1284 = vmatprep.subr.bf16.mxu1 %v1731_v0  ;;  %v1448_v12 = vld [vmem:[#allocation7 + $0x18] sm:$0xff]   ;;  %v1443_v13 = vld [vmem:[#allocation5] sm:$0xff]   ;;  %v1449_v14 = vld [vmem:[#allocation7 + $0x10] sm:$0xff]  }
  0x72   :  { %v175_v15 = vld [vmem:[#allocation2] sm:$0xf]  ;;  %v1450_v16 = vld [vmem:[#allocation7 + $0x8] sm:$0xff]   ;;  %v1451_v17 = vld [vmem:[#allocation7] sm:$0xff]  }
  0x73   :  { %v1452_v18 = vld [vmem:[#allocation8 + $0x38] sm:$0xff]   ;;  %v1453_v19 = vld [vmem:[#allocation8 + $0x30] sm:$0xff]   ;;  %v1454_v20 = vld [vmem:[#allocation8 + $0x28] sm:$0xff]  }
  0x74   :  { %1265 = vmatpush3.bf16.msra.mxu0 %v1437_v2  ;;  %1285 = vmatpush3.bf16.msra.mxu1 %v1445_v6  ;;  %v1455_v21 = vld [vmem:[#allocation8 + $0x20] sm:$0xff]   ;;  %v1456_v22 = vld [vmem:[#allocation8 + $0x18] sm:$0xff]   ;;  %v1457_v23 = vld [vmem:[#allocation8 + $0x10] sm:$0xff]  }
  0x75   :  { %1266 = vmatprep.subr.bf16.mxu0 %v1731_v0  ;;  %1286 = vmatprep.subr.bf16.mxu1 %v1731_v0  ;;  %v1115_v24 = vld [vmem:[%s1976_s2] ss:$0 sm:$0xff]  ;;  %v1458_v33 = vld [vmem:[#allocation8 + $0x8] sm:$0xff]   ;;  %v1459_v34 = vld [vmem:[#allocation8] sm:$0xff]  }
  0x76   :  { %v1460_v35 = vld [vmem:[#allocation11 + $0x38] sm:$0xff]   ;;  %v1461_v36 = vld [vmem:[#allocation11 + $0x30] sm:$0xff]   ;;  %v1462_v37 = vld [vmem:[#allocation11 + $0x28] sm:$0xff]  }
  0x77   :  { %v1463_v38 = vld [vmem:[#allocation11 + $0x20] sm:$0xff]   ;;  %v1464_v39 = vld [vmem:[#allocation11 + $0x18] sm:$0xff]   ;;  %v1465_v40 = vld [vmem:[#allocation11 + $0x10] sm:$0xff]  }
  0x78   :  { %1267 = vmatpush3.bf16.msra.mxu0 %v1438_v3  ;;  %1287 = vmatpush3.bf16.msra.mxu1 %v1446_v8  ;;  %v1466_v41 = vld [vmem:[#allocation11 + $0x8] sm:$0xff]   ;;  %v1124_v42 = vld [vmem:[%s1978_s4] ss:$0 sm:$0xff]  ;;  %v1467_v51 = vld [vmem:[#allocation11] sm:$0xff]  }
  0x79   :  { %1268 = vmatprep.subr.bf16.mxu0 %v1731_v0  ;;  %1288 = vmatprep.subr.bf16.mxu1 %v1731_v0  ;;  %v1133_v52 = vld [vmem:[%s1980_s6] ss:$0 sm:$0xff]  ;;  %v1469_v3 = vld [vmem:[#allocation10 + $0x30] sm:$0xff]   ;;  %v1470_v4 = vld [vmem:[#allocation10 + $0x28] sm:$0xff]  }
  0x7a   :  { %v1142_v59 = vld [vmem:[%s1983_s9] ss:$0 sm:$0xff] }
  0x7b   :  { %v1468_v2 = vld [vmem:[#allocation10 + $0x38] sm:$0xff]  }
  0x7c   :  { %1269 = vmatpush3.bf16.msra.mxu0 %v1439_v5  ;;  %1289 = vmatpush3.bf16.msra.mxu1 %v1447_v10  ;;  %v1472_v10 = vld [vmem:[#allocation10 + $0x18] sm:$0xff]  }
  0x7d   :  { %1270 = vmatprep.subr.bf16.mxu0 %v1731_v0  ;;  %1290 = vmatprep.subr.bf16.mxu1 %v1731_v0 }
  0x80   :  { %1271 = vmatpush3.bf16.msra.mxu0 %v1440_v7  ;;  %1291 = vmatpush3.bf16.msra.mxu1 %v1448_v12  ;;  %v1474_v12 = vld [vmem:[#allocation10 + $0x8] sm:$0xff]  }
  0x81   :  { %1272 = vmatprep.subr.bf16.mxu0 %v1731_v0  ;;  %1292 = vmatprep.subr.bf16.mxu1 %v1731_v0 }
  0x84   :  { %1273 = vmatpush3.bf16.msra.mxu0 %v1441_v9  ;;  %1293 = vmatpush3.bf16.msra.mxu1 %v1449_v14  ;;  %v1471_v9 = vld [vmem:[#allocation10 + $0x20] sm:$0xff]   ;;  %v1476_v14 = vld [vmem:[#allocation13 + $0x38] sm:$0xff]  }
  0x85   :  { %1274 = vmatprep.subr.bf16.mxu0 %v1731_v0  ;;  %1294 = vmatprep.subr.bf16.mxu1 %v1731_v0 }
  0x88   :  { %1275 = vmatpush3.bf16.msra.mxu0 %v1442_v11  ;;  %1295 = vmatpush3.bf16.msra.mxu1 %v1450_v16  ;;  %v1473_v11 = vld [vmem:[#allocation10 + $0x10] sm:$0xff]   ;;  %v1478_v16 = vld [vmem:[#allocation13 + $0x28] sm:$0xff]  }
  0x89   :  { %1276 = vmatprep.subr.bf16.mxu0 %v1731_v0  ;;  %1296 = vmatprep.subr.bf16.mxu1 %v1731_v0 }
  0x8c   :  { %1277 = vmatpush3.bf16.msra.mxu0 %v1443_v13  ;;  %1297 = vmatpush3.bf16.msra.mxu1 %v1451_v17  ;;  %v1475_v13 = vld [vmem:[#allocation10] sm:$0xff]  }
  0x8d   :  { %1302 = vmatprep.subr.bf16.mxu0 %v1731_v0  ;;  %1322 = vmatprep.subr.bf16.mxu1 %v1731_v0  ;;  %v1479_v17 = vld [vmem:[#allocation13 + $0x20] sm:$0xff]  }
  0x8f   :  { %1279 = vmatmul.mubr.bf16.vlgmr.msra.gmra.mxu0 %v175_v15  ;;  %v1477_v15 = vld [vmem:[#allocation13 + $0x30] sm:$0xff]  }
  0x90   :  { %1318 = vmatprep.mubr.msk.bf16.mxu0 %vm1732_vm0, %v1731_v0  ;;  %1303 = vmatpush3.bf16.msra.mxu0 %v1452_v18  ;;  %v1480_v18 = vld [vmem:[#allocation13 + $0x18] sm:$0xff]  }
  0x91   :  { %1304 = vmatprep.subr.bf16.mxu0 %v1731_v0 }
  0x94   :  { %1305 = vmatpush3.bf16.msra.mxu0 %v1453_v19  ;;  %v1481_v19 = vld [vmem:[#allocation13 + $0x10] sm:$0xff]  }
  0x95   :  { %1306 = vmatprep.subr.bf16.mxu0 %v1731_v0 }
  0x98   :  { %1307 = vmatpush3.bf16.msra.mxu0 %v1454_v20  ;;  %v1482_v20 = vld [vmem:[#allocation13 + $0x8] sm:$0xff]  }
  0x99   :  { %1308 = vmatprep.subr.bf16.mxu0 %v1731_v0 }
  0x9c   :  { %1309 = vmatpush3.bf16.msra.mxu0 %v1455_v21 }
  0x9d   :  { %1310 = vmatprep.subr.bf16.mxu0 %v1731_v0 }
  0xa0   :  { %1311 = vmatpush3.bf16.msra.mxu0 %v1456_v22 }
  0xa1   :  { %1312 = vmatprep.subr.bf16.mxu0 %v1731_v0 }
  0xa4   :  { %1313 = vmatpush3.bf16.msra.mxu0 %v1457_v23 }
  0xa5   :  { %1314 = vmatprep.subr.bf16.mxu0 %v1731_v0 }
  0xa8   :  { %1315 = vmatpush3.bf16.msra.mxu0 %v1458_v33 }
  0xa9   :  { %1316 = vmatprep.subr.bf16.mxu0 %v1731_v0 }
  0xac   :  { %1317 = vmatpush3.bf16.msra.mxu0 %v1459_v34 }
  0xad   :  { %1342 = vmatprep.subr.bf16.mxu0 %v1731_v0 }
 0x14f   :  { %v281_v25 = vpop.f32.mrf.mxu0 }
 0x150   :  { %v282_v26 = vadd.f32 %v1115_v24, %v281_v25 }
 0x151   :  { %v1280_v27 = vpop.f32.mrf.mxu0 }
 0x152   :  { %vm287_vm1 = vcmp.ge.f32.partialorder %v282_v26, 0.0  ;;  %v288_v28 = vmul.f32 0.01, %v282_v26  ;;  %v1484_v27 = vld [vmem:[#allocation14 + $0x38] sm:$0xff]  }
 0x153   :  { %v284_v29 = vpop.f32.mrf.mxu0 }
 0x154   :  { %v289_v30 = vsel %vm287_vm1, %v282_v26, %v288_v28  ;;  %v1483_v26 = vld [vmem:[#allocation13] sm:$0xff]   ;;  %v1485_v28 = vld [vmem:[#allocation14 + $0x30] sm:$0xff]   ;;  %v1486_v29 = vld [vmem:[#allocation14 + $0x28] sm:$0xff]  }
 0x155   :  { %v1281_v31 = vpop.f32.mrf.mxu0  ;;  %v290_v32 = vpack.c.bf16 %v289_v30, %v289_v30  ;;  %v1487_v30 = vld [vmem:[#allocation14 + $0x20] sm:$0xff]  }
 0x156   :  { %v1488_v31 = vld [vmem:[#allocation14 + $0x18] sm:$0xff]  }
 0x157   :  { %1299 = vmatmul.mubr.bf16.vlgmr.msra.gmra.mxu1 %v290_v32  ;;  %v1489_v32 = vld [vmem:[#allocation14 + $0x10] sm:$0xff]  }
 0x158   :  { %1338 = vmatprep.mubr.msk.bf16.mxu1 %vm1732_vm0, %v1731_v0  ;;  %1323 = vmatpush3.bf16.msra.mxu1 %v1460_v35 }
 0x159   :  { %1324 = vmatprep.subr.bf16.mxu1 %v1731_v0 }
 0x15c   :  { %1325 = vmatpush3.bf16.msra.mxu1 %v1461_v36 }
 0x15d   :  { %1326 = vmatprep.subr.bf16.mxu1 %v1731_v0 }
 0x160   :  { %1327 = vmatpush3.bf16.msra.mxu1 %v1462_v37 }
 0x161   :  { %1328 = vmatprep.subr.bf16.mxu1 %v1731_v0 }
 0x164   :  { %1329 = vmatpush3.bf16.msra.mxu1 %v1463_v38  ;;  %v1490_v38 = vld [vmem:[#allocation14 + $0x8] sm:$0xff]  }
 0x165   :  { %1330 = vmatprep.subr.bf16.mxu1 %v1731_v0 }
 0x168   :  { %1331 = vmatpush3.bf16.msra.mxu1 %v1464_v39  ;;  %v1491_v39 = vld [vmem:[#allocation14] sm:$0xff]  }
 0x169   :  { %1332 = vmatprep.subr.bf16.mxu1 %v1731_v0 }
 0x16c   :  { %1333 = vmatpush3.bf16.msra.mxu1 %v1465_v40  ;;  %v1492_v40 = vld [vmem:[#allocation16 + $0x38] sm:$0xff]  }
 0x16d   :  { %1334 = vmatprep.subr.bf16.mxu1 %v1731_v0 }
 0x170   :  { %1335 = vmatpush3.bf16.msra.mxu1 %v1466_v41  ;;  %v1493_v41 = vld [vmem:[#allocation16 + $0x30] sm:$0xff]  }
 0x171   :  { %1336 = vmatprep.subr.bf16.mxu1 %v1731_v0 }
 0x174   :  { %1337 = vmatpush3.bf16.msra.mxu1 %v1467_v51 }
 0x175   :  { %1362 = vmatprep.subr.bf16.mxu1 %v1731_v0 }
 0x217   :  { %v396_v43 = vpop.f32.mrf.mxu1 }
 0x218   :  { %v397_v44 = vadd.f32 %v1124_v42, %v396_v43  ;;  %v1494_v42 = vld [vmem:[#allocation16 + $0x28] sm:$0xff]   ;;  %v1495_v43 = vld [vmem:[#allocation16 + $0x20] sm:$0xff]  }
 0x219   :  { %v1300_v45 = vpop.f32.mrf.mxu1 }
 0x21a   :  { %vm402_vm2 = vcmp.ge.f32.partialorder %v397_v44, 0.0  ;;  %v403_v46 = vmul.f32 0.01, %v397_v44  ;;  %v1497_v45 = vld [vmem:[#allocation16 + $0x10] sm:$0xff]  }
 0x21b   :  { %v399_v47 = vpop.f32.mrf.mxu1 }
 0x21c   :  { %v404_v48 = vsel %vm402_vm2, %v397_v44, %v403_v46  ;;  %v1496_v44 = vld [vmem:[#allocation16 + $0x18] sm:$0xff]  }
 0x21d   :  { %v405_v49 = vpack.c.bf16 %v404_v48, %v404_v48  ;;  %v1301_v50 = vpop.f32.mrf.mxu1  ;;  %v1163_v46 = vld [vmem:[%s1985_s11] ss:$0 sm:$0xff] }
 0x21f   :  { %1319 = vmatmul.mubr.bf16.vlgmr.msra.gmra.mxu0 %v405_v49 }
 0x220   :  { %1358 = vmatprep.mubr.msk.bf16.mxu0 %vm1732_vm0, %v1731_v0  ;;  %1343 = vmatpush3.bf16.msra.mxu0 %v1468_v2 }
 0x221   :  { %1344 = vmatprep.subr.bf16.mxu0 %v1731_v0 }
 0x224   :  { %1345 = vmatpush3.bf16.msra.mxu0 %v1469_v3 }
 0x225   :  { %1346 = vmatprep.subr.bf16.mxu0 %v1731_v0 }
 0x228   :  { %1347 = vmatpush3.bf16.msra.mxu0 %v1470_v4 }
 0x229   :  { %1348 = vmatprep.subr.bf16.mxu0 %v1731_v0 }
 0x22c   :  { %1349 = vmatpush3.bf16.msra.mxu0 %v1471_v9 }
 0x22d   :  { %1350 = vmatprep.subr.bf16.mxu0 %v1731_v0 }
 0x230   :  { %1351 = vmatpush3.bf16.msra.mxu0 %v1472_v10 }
 0x231   :  { %1352 = vmatprep.subr.bf16.mxu0 %v1731_v0 }
 0x234   :  { %1353 = vmatpush3.bf16.msra.mxu0 %v1473_v11 }
 0x235   :  { %1354 = vmatprep.subr.bf16.mxu0 %v1731_v0 }
 0x238   :  { %1355 = vmatpush3.bf16.msra.mxu0 %v1474_v12 }
 0x239   :  { %1356 = vmatprep.subr.bf16.mxu0 %v1731_v0 }
 0x23c   :  { %1357 = vmatpush3.bf16.msra.mxu0 %v1475_v13 }
 0x23d   :  { %1382 = vmatprep.subr.bf16.mxu0 %v1731_v0 }
 0x2df   :  { %v511_v53 = vpop.f32.mrf.mxu0 }
 0x2e0   :  { %v512_v54 = vadd.f32 %v1133_v52, %v511_v53 }
 0x2e1   :  { %v1320_v55 = vpop.f32.mrf.mxu0 }
 0x2e2   :  { %v517_v56 = vpack.c.bf16 %v512_v54, %v512_v54  ;;  %v1498_v55 = vld [vmem:[#allocation16 + $0x8] sm:$0xff]  }
 0x2e3   :  { %v514_v57 = vpop.f32.mrf.mxu0 }
 0x2e4   :  { %1339 = vmatmul.mubr.bf16.vlgmr.msra.gmra.mxu1 %v517_v56  ;;  %v1499_v56 = vld [vmem:[#allocation16] sm:$0xff]   ;;  %v1172_v57 = vld [vmem:[%s1987_s13] ss:$0 sm:$0xff]  ;;  %s1733_s13 = smov [#allocation17]  }
 0x2e5   :  { %v1321_v58 = vpop.f32.mrf.mxu0  ;;  %1378 = vmatprep.mubr.msk.bf16.mxu1 %vm1732_vm0, %v1731_v0  ;;  %1363 = vmatpush3.bf16.msra.mxu1 %v1476_v14  ;;  %s1102_s22 = sshll.u32 %s1733_s13, 4  ;;  %s1103_s22 = int_to_ptr.vmem [resolvable:$true] %s1102_s22 }
 0x2e6   :  { %1364 = vmatprep.subr.bf16.mxu1 %v1731_v0  ;;  %s1688_s23 = scalar_lea.vmem %s1103_s22, 64  ;;  %p1693_p4 = scmp.lt.s32.totalorder %s1103_s22, %s1103_s22 }
 0x2e7   :  { %p1689_p3 = scmp.ne.s32.totalorder %s1103_s22, %s1688_s23  ;;  %p1694_p5 = scmp.lt.s32.totalorder %s1688_s23, %s1688_s23 }
 0x2e9   :  { %1365 = vmatpush3.bf16.msra.mxu1 %v1477_v15  ;;  %p1695_p6 = por %p1694_p5, %p1693_p4 }
 0x2ea   :  { %1366 = vmatprep.subr.bf16.mxu1 %v1731_v0 }
 0x2eb   :  { %p1696_p7 = pnand %p1695_p6, %p1689_p3 }
 0x2ed   :  { %1367 = vmatpush3.bf16.msra.mxu1 %v1478_v16 }
 0x2ee   :  { %1368 = vmatprep.subr.bf16.mxu1 %v1731_v0 }
 0x2f1   :  { %1369 = vmatpush3.bf16.msra.mxu1 %v1479_v17 }
 0x2f2   :  { %1370 = vmatprep.subr.bf16.mxu1 %v1731_v0 }
 0x2f5   :  { %1371 = vmatpush3.bf16.msra.mxu1 %v1480_v18 }
 0x2f6   :  { %1372 = vmatprep.subr.bf16.mxu1 %v1731_v0 }
 0x2f9   :  { %1373 = vmatpush3.bf16.msra.mxu1 %v1481_v19 }
 0x2fa   :  { %1374 = vmatprep.subr.bf16.mxu1 %v1731_v0 }
 0x2fd   :  { %1375 = vmatpush3.bf16.msra.mxu1 %v1482_v20 }
 0x2fe   :  { %1376 = vmatprep.subr.bf16.mxu1 %v1731_v0 }
 0x301   :  { %1377 = vmatpush3.bf16.msra.mxu1 %v1483_v26 }
 0x302   :  { %1402 = vmatprep.subr.bf16.mxu1 %v1731_v0 }
 0x3a4   :  { %v623_v60 = vpop.f32.mrf.mxu1 }
 0x3a5   :  { %v624_v61 = vadd.f32 %v1142_v59, %v623_v60 }
 0x3a6   :  { %v1340_v62 = vpop.f32.mrf.mxu1 }
 0x3a7   :  { %629 = vmax.xlane.f32.xlu0 %v624_v61 }
 0x3a8   :  { %v626_v63 = vpop.f32.mrf.mxu1 }
 0x3aa   :  { %v1341_v1 = vpop.f32.mrf.mxu1 }
 0x430   :  { %v630_v5 = vpop.xlane.xlu0 %629 }
 0x431   :  { %v631_v6 = vsub.f32 %v624_v61, %v630_v5 }
 0x433   :  { %v632_v7 = vmul.f32 1.442695, %v631_v6 }
 0x435   :  { %1500 = vpow2.f32 %v632_v7 }
 0x442   :  { %v1501_v8 = vpop.eup %1500 }
 0x443   :  { %634 = vadd.xlane.f32.xlu0 %v1501_v8 }
 0x4cc   :  { %v635_v21 = vpop.xlane.xlu0 %634 }
 0x4cd   :  { %1502 = vrcp.f32 %v635_v21 }
 0x4da   :  { %v1503_v22 = vpop.eup %1502 }
 0x4db   :  { %v637_v23 = vmul.f32 %v1503_v22, %v1501_v8 }
 0x4dd   :  { %vm638_vm3 = vcmp.gt.f32.partialorder %v637_v23, 0.0025  ;;  %v1151_v24 = vadd.f32 -0.0025, %v637_v23 }
 0x4de   :  { %vm1160_vm4 = vmpackc.low %vm638_vm3, %vm638_vm3 }
 0x4df   :  { %v1161_v25 = vpack.c.bf16 %v1151_v24, %v1151_v24 }
 0x4e1   :  { %1359 = vmatmul.mubr.msk.bf16.vlgmr.msra.gmra.mxu0 %vm1160_vm4, %v1161_v25 }
 0x4e2   :  { %1398 = vmatprep.mubr.msk.bf16.mxu0 %vm1732_vm0, %v1731_v0  ;;  %1383 = vmatpush3.bf16.msra.mxu0 %v1484_v27 }
 0x4e3   :  { %1384 = vmatprep.subr.bf16.mxu0 %v1731_v0 }
 0x4e6   :  { %1385 = vmatpush3.bf16.msra.mxu0 %v1485_v28 }
 0x4e7   :  { %1386 = vmatprep.subr.bf16.mxu0 %v1731_v0 }
 0x4ea   :  { %1387 = vmatpush3.bf16.msra.mxu0 %v1486_v29 }
 0x4eb   :  { %1388 = vmatprep.subr.bf16.mxu0 %v1731_v0 }
 0x4ee   :  { %1389 = vmatpush3.bf16.msra.mxu0 %v1487_v30 }
 0x4ef   :  { %1390 = vmatprep.subr.bf16.mxu0 %v1731_v0 }
 0x4f2   :  { %1391 = vmatpush3.bf16.msra.mxu0 %v1488_v31 }
 0x4f3   :  { %1392 = vmatprep.subr.bf16.mxu0 %v1731_v0 }
 0x4f6   :  { %1393 = vmatpush3.bf16.msra.mxu0 %v1489_v32 }
 0x4f7   :  { %1394 = vmatprep.subr.bf16.mxu0 %v1731_v0 }
 0x4fa   :  { %1395 = vmatpush3.bf16.msra.mxu0 %v1490_v38 }
 0x4fb   :  { %1396 = vmatprep.subr.bf16.mxu0 %v1731_v0 }
 0x4fe   :  { %1397 = vmatpush3.bf16.msra.mxu0 %v1491_v39 }
 0x5a1   :  { %v740_v33 = vpop.f32.mrf.mxu0 }
 0x5a2   :  { %v746_v34 = vpack.c.bf16 %v740_v33, %v740_v33 }
 0x5a3   :  { %v1360_v35 = vpop.f32.mrf.mxu0 }
 0x5a4   :  { %1379 = vmatmul.mubr.bf16.vlgmr.msra.gmra.mxu1 %v746_v34 }
 0x5a5   :  { %v743_v36 = vpop.f32.mrf.mxu0  ;;  %1418 = vmatprep.mubr.msk.bf16.mxu1 %vm1732_vm0, %v1731_v0  ;;  %1403 = vmatpush3.bf16.msra.mxu1 %v1492_v40 }
 0x5a6   :  { %1404 = vmatprep.subr.bf16.mxu1 %v1731_v0 }
 0x5a7   :  { %v1361_v37 = vpop.f32.mrf.mxu0 }
 0x5a9   :  { %1405 = vmatpush3.bf16.msra.mxu1 %v1493_v41 }
 0x5aa   :  { %1406 = vmatprep.subr.bf16.mxu1 %v1731_v0 }
 0x5ad   :  { %1407 = vmatpush3.bf16.msra.mxu1 %v1494_v42 }
 0x5ae   :  { %1408 = vmatprep.subr.bf16.mxu1 %v1731_v0 }
 0x5b1   :  { %1409 = vmatpush3.bf16.msra.mxu1 %v1495_v43 }
 0x5b2   :  { %1410 = vmatprep.subr.bf16.mxu1 %v1731_v0 }
 0x5b5   :  { %1411 = vmatpush3.bf16.msra.mxu1 %v1496_v44 }
 0x5b6   :  { %1412 = vmatprep.subr.bf16.mxu1 %v1731_v0 }
 0x5b9   :  { %1413 = vmatpush3.bf16.msra.mxu1 %v1497_v45 }
 0x5ba   :  { %1414 = vmatprep.subr.bf16.mxu1 %v1731_v0 }
 0x5bd   :  { %1415 = vmatpush3.bf16.msra.mxu1 %v1498_v55 }
 0x5be   :  { %1416 = vmatprep.subr.bf16.mxu1 %v1731_v0  ;;  %v1181_v0 = vld [vmem:[%s1989_s15] ss:$0 sm:$0xff] }
 0x5c1   :  { %1417 = vmatpush3.bf16.msra.mxu1 %v1499_v56 }
 0x664   :  { %v852_v47 = vpop.f32.mrf.mxu1 }
 0x665   :  { %v853_v48 = vadd.f32 %v1163_v46, %v852_v47 }
 0x666   :  { %v1380_v49 = vpop.f32.mrf.mxu1 }
 0x667   :  { %vm858_vm5 = vcmp.ge.f32.partialorder %v853_v48, 0.0  ;;  %v859_v50 = vmul.f32 0.01, %v853_v48 }
 0x668   :  { %v855_v51 = vpop.f32.mrf.mxu1 }
 0x669   :  { %v860_v52 = vsel %vm858_vm5, %v853_v48, %v859_v50 }
 0x66a   :  { %v861_v53 = vpack.c.bf16 %v860_v52, %v860_v52  ;;  %v1381_v54 = vpop.f32.mrf.mxu1 }
 0x66c   :  { %1399 = vmatmul.mubr.bf16.vlgmr.msra.gmra.mxu0 %v861_v53 }
 0x72c   :  { %v967_v58 = vpop.f32.mrf.mxu0 }
 0x72d   :  { %v968_v59 = vadd.f32 %v1172_v57, %v967_v58 }
 0x72e   :  { %v1400_v60 = vpop.f32.mrf.mxu0 }
 0x72f   :  { %vm973_vm6 = vcmp.ge.f32.partialorder %v968_v59, 0.0  ;;  %v974_v61 = vmul.f32 0.01, %v968_v59 }
 0x730   :  { %v970_v62 = vpop.f32.mrf.mxu0 }
 0x731   :  { %v975_v63 = vsel %vm973_vm6, %v968_v59, %v974_v61 }
 0x732   :  { %v976_v1 = vpack.c.bf16 %v975_v63, %v975_v63  ;;  %v1401_v2 = vpop.f32.mrf.mxu0 }
 0x734   :  { %1419 = vmatmul.mubr.bf16.vlgmr.msra.gmra.mxu1 %v976_v1 }
 0x7f4   :  { %v1082_v3 = vpop.f32.mrf.mxu1 }
 0x7f5   :  { %v1083_v4 = vadd.f32 %v1181_v0, %v1082_v3 }
 0x7f6   :  { %v1420_v5 = vpop.f32.mrf.mxu1 }
 0x7f7   :  { %v1088_v6 = vsub.f32 0.0, %v1083_v4 }
 0x7f8   :  { %v1085_v7 = vpop.f32.mrf.mxu1 }
 0x7f9   :  { %v1089_v8 = vmul.f32 1.442695, %v1088_v6 }
 0x7fa   :  { %v1421_v9 = vpop.f32.mrf.mxu1 }
 0x7fb   :  { %1504 = vpow2.f32 %v1089_v8 }
 0x808   :  { %v1505_v10 = vpop.eup %1504 }
 0x809   :  { %v1091_v11 = vadd.f32 1.0, %v1505_v10 }
 0x80b   :  { %1506 = vrcp.f32 %v1091_v11 }
 0x818   :  { %v1507_v12 = vpop.eup %1506 }
 0x819   :  { %v1094_v13 = vpack.c.bf16 %v1507_v12, %v1507_v12 }
 0x81b   :  { %1095 = vst [vmem:[#allocation17] sm:$0xf] %v1094_v13 }
 0x81c   :  { %1699 = shalt.err (!%p1696_p7)
}
 0x81d   :  { %1105 = dma.vmem_to_hbm [thread:$0]  %s1103_s22, 64, %s1990_s16, [#allocation4]  }
 0x81e   :  { %1718 = dma.done.wait [#allocation4], 64  }
 0x81f   :  { %1719 = vsyncadd [#allocation4], 4294967232 }
 0x820   :  { %1109 = vsyncpa [#allocation3], 1 }
 0x821   :  { %1110 = vsyncpa [#allocation6], 1 }
 0x822   :  { %1111 = vsyncpa [#allocation9], 1 }
 0x823   :  { %1112 = vsyncpa [#allocation12], 1 }
 0x824   :  { %1113 = vsyncpa [#allocation15], 1 }
 0x825   :  { %1114 = vsyncpa [#allocation4], 1 }

</bundles_post_ra>
